<compile_context>
chip_gen: v5e
topology: v5e:2x2
jax: 0.10.0
libtpu: 0.0.40
codegen_flags: <defaults>
</compile_context>

<pallas_src>
import jax
import jax.numpy as jnp
from jax.experimental import pallas as pl
from jax.experimental.pallas import tpu as pltpu


def _round_up(a: int, b: int) -> int:
    return (a + b - 1) // b * b


def _choose_tile(dim_padded: int, max_tile: int, align: int) -> int:
    """Largest multiple of `align` that is <= max_tile and divides dim_padded."""
    t = min(max_tile, dim_padded)
    t -= t % align
    t = max(t, align)
    while dim_padded % t:
        t -= align
    return t


def _maybe_pad_cast_2d(a, rows: int, cols: int, dtype):
    """Cast / zero-pad only when actually needed (skip no-op HBM passes)."""
    if a.dtype != jnp.dtype(dtype):
        a = a.astype(dtype)
    r, c = a.shape
    if r != rows or c != cols:
        a = jnp.pad(a, ((0, rows - r), (0, cols - c)))
    return a


def _matmul_bias_relu_kernel(x_ref, w_ref, b_ref, o_ref, acc_ref):
    """One (tm, tn) output tile; K is the innermost ('arbitrary') reduction axis."""
    k = pl.program_id(2)

    @pl.when(k == 0)
    def _init():
        # Seed the accumulator with the broadcast bias -> no add in the epilogue.
        acc_ref[...] = jnp.broadcast_to(
            b_ref[...].astype(jnp.float32), acc_ref.shape)

    acc_ref[...] += jnp.dot(
        x_ref[...], w_ref[...], preferred_element_type=jnp.float32)

    @pl.when(k == pl.num_programs(2) - 1)
    def _finalize():
        o_ref[...] = jnp.maximum(acc_ref[...], 0.0).astype(o_ref.dtype)


def prepare_params(weight, bias, compute_dtype=None):
    """Pad + cast layer1 parameters once (they are static across forward calls).

    Returns (w_padded(Kp,Hp), bias_padded(1,Hp) f32, Din, H).
    Padding is to fixed 128-lane granularity, independent of tile size.
    """
    Din, H = weight.shape
    cdt = jnp.dtype(compute_dtype) if compute_dtype is not None else weight.dtype
    Kp = _round_up(Din, 128)
    Hp = _round_up(H, 128)
    w_p = _maybe_pad_cast_2d(weight, Kp, Hp, cdt)
    b_flat = jnp.asarray(bias).reshape(-1)
    assert b_flat.shape[0] == H, "bias must contain exactly H elements"
    b_p = _maybe_pad_cast_2d(b_flat.reshape(1, H), 1, Hp, jnp.float32)
    return w_p, b_p, Din, H


def ex_lrest_self_atten_forward(x, weight=None, bias=None, *, tm=512, tn=512,
                                tk=1024, compute_dtype=None,
                                prepared_params=None):
    """x: (B, S, Din) -> ReLU(x @ weight + bias): (B, S, H).

    Matches ExLRestSelfAtten.layer1 + ReLU (the well-defined part of forward).
    compute_dtype=None keeps x.dtype (f32 reference numerics); pass
    jnp.bfloat16 explicitly for MXU-peak throughput (f32 accumulation either way).
    """
    B, S, Din_x = x.shape
    out_dtype = x.dtype

    if prepared_params is None:
        cdt_req = compute_dtype if compute_dtype is not None else x.dtype
        prepared_params = prepare_params(weight, bias, cdt_req)
    w_p, b_p, Din, H = prepared_params
    assert Din == Din_x, "weight fan-in must match x's last dim"
    cdt = w_p.dtype
    Kp, Hp = w_p.shape

    # --- pad activations (granularity decoupled from tile size) -------------
    M = B * S
    m_align = 8 if jnp.dtype(cdt).itemsize >= 4 else 16   # sublane packing
    Mp = _round_up(M, m_align)
    x2 = _maybe_pad_cast_2d(x.reshape(M, Din), Mp, Kp, cdt)

    # --- tile selection: divisors of the padded extents ---------------------
    tm_e = _choose_tile(Mp, tm, 8)
    tn_e = _choose_tile(Hp, tn, 128)
    tk_e = _choose_tile(Kp, tk, 128)

    # v7x megacore: guarantee >= 2 blocks across the 'parallel' axes so both
    # TensorCores get work (halve M tile first, then N).
    if (Mp // tm_e) * (Hp // tn_e) < 2:
        half_m, half_n = tm_e // 2, tn_e // 2
        if half_m >= 8 and half_m % 8 == 0 and Mp % half_m == 0:
            tm_e = half_m
        elif half_n >= 128 and half_n % 128 == 0 and Hp % half_n == 0:
            tn_e = half_n

    grid = (Mp // tm_e, Hp // tn_e, Kp // tk_e)

    # --- VMEM budget: double-buffered inputs/outputs + f32 accumulator ------
    in_b = jnp.dtype(cdt).itemsize
    out_b = jnp.dtype(out_dtype).itemsize
    est = (2 * (tm_e * tk_e + tk_e * tn_e) * in_b   # double-buffered x / W tiles
           + 2 * tm_e * tn_e * out_b                # double-buffered output tile
           + tm_e * tn_e * 4                        # f32 accumulator scratch
           + 2 * tn_e * 4)                          # bias tile
    # Headroom, but stay under v7x's 64 MiB physical VMEM.
    vmem_limit = int(max(32 * 1024 * 1024, min(2 * est, 64 * 1024 * 1024)))

    out_p = pl.pallas_call(
        _matmul_bias_relu_kernel,
        out_shape=jax.ShapeDtypeStruct((Mp, Hp), out_dtype),
        grid_spec=pltpu.PrefetchScalarGridSpec(
            num_scalar_prefetch=0,
            grid=grid,
            in_specs=[
                pl.BlockSpec((tm_e, tk_e), lambda i, j, k: (i, k)),  # x M/K tile
                pl.BlockSpec((tk_e, tn_e), lambda i, j, k: (k, j)),  # W K/N tile
                pl.BlockSpec((1, tn_e), lambda i, j, k: (0, j)),     # bias N tile
            ],
            out_specs=pl.BlockSpec((tm_e, tn_e), lambda i, j, k: (i, j)),
            scratch_shapes=[pltpu.VMEM((tm_e, tn_e), jnp.float32)],
        ),
        compiler_params=pltpu.CompilerParams(
            # M/N tiles independent -> shard across TensorCores; K is the
            # reduction over the resident accumulator (must stay last).
            dimension_semantics=("parallel", "parallel", "arbitrary"),
            vmem_limit_bytes=vmem_limit,
        ),
    )(x2, w_p, b_p)

    out = out_p
    if Mp != M or Hp != H:
        out = out[:M, :H]
    return out.reshape(B, S, H)


def ex_lrest_self_atten_reference(x, weight, bias):
    return jnp.maximum(jnp.matmul(x, weight) + bias, 0.0)


if __name__ == "__main__":
    batch, seq = 2, 8
    input_size, hidden_size = 128, 64   # hidden_size matches the module spec

    key = jax.random.PRNGKey(0)
    kx, kw = jax.random.split(key)

    x = jax.random.normal(kx, (batch, seq, input_size), dtype=jnp.float32)

    # torch.nn.init.xavier_normal_: std = sqrt(2 / (fan_in + fan_out))
    xavier_std = (2.0 / (input_size + hidden_size)) ** 0.5
    weight = xavier_std * jax.random.normal(
        kw, (input_size, hidden_size), dtype=jnp.float32)
    bias = jnp.zeros((1, 1, hidden_size), dtype=jnp.float32)  # same as torch.zeros

    # Pad/cast the static layer1 parameters ONCE, outside the per-call path.
    params = prepare_params(weight, bias)        # f32 compute (matches torch)

    out = ex_lrest_self_atten_forward(x, prepared_params=params)
    out = jax.block_until_ready(out)

    ref = ex_lrest_self_atten_reference(x, weight, bias)
    assert out.shape == (batch, seq, hidden_size)
    assert jnp.allclose(out, ref, atol=2e-2, rtol=2e-2), "mismatch vs reference"

    print("KERNEL_OK")
</pallas_src>

<mosaic_0001>
module attributes {stable_mosaic.version = 11 : i64} {
  func.func @_matmul_bias_relu_kernel(%arg0: i32, %arg1: i32, %arg2: i32, %arg3: memref<8x128xf32, #tpu.memory_space<vmem>>, %arg4: memref<128x128xf32, #tpu.memory_space<vmem>>, %arg5: memref<1x128xf32, #tpu.memory_space<vmem>>, %arg6: memref<8x128xf32, #tpu.memory_space<vmem>>, %arg7: memref<8x128xf32, #tpu.memory_space<vmem>>) attributes {dimension_semantics = [#tpu.dimension_semantics<parallel>, #tpu.dimension_semantics<parallel>, #tpu.dimension_semantics<arbitrary>], iteration_bounds = array<i64: 2, 1, 1>, scalar_prefetch = 0 : i64, scratch_operands = 1 : i64, tpu.core_type = #tpu.core_type<tc>, window_params = [{transform_indices = @transform_0, window_bounds = array<i64: 8, 128>}, {transform_indices = @transform_1, window_bounds = array<i64: 128, 128>}, {transform_indices = @transform_2, window_bounds = array<i64: 1, 128>}, {transform_indices = @transform_3, window_bounds = array<i64: 8, 128>}]} {
    %c0_i32 = arith.constant 0 : i32
    %0 = arith.cmpi eq, %arg2, %c0_i32 : i32
    %1 = arith.extui %0 : i1 to i32
    %c0_i32_0 = arith.constant 0 : i32
    %2 = arith.cmpi ne, %1, %c0_i32_0 : i32
    scf.if %2 {
      %c0_10 = arith.constant 0 : index
      %c0_11 = arith.constant 0 : index
      %12 = vector.load %arg5[%c0_10, %c0_11] : memref<1x128xf32, #tpu.memory_space<vmem>>, vector<1x128xf32>
      %13 = vector.shape_cast %12 : vector<1x128xf32> to vector<1x128xf32>
      %14 = vector.broadcast %13 : vector<1x128xf32> to vector<8x128xf32>
      %c0_12 = arith.constant 0 : index
      %c0_13 = arith.constant 0 : index
      %15 = vector.load %arg7[%c0_12, %c0_13] : memref<8x128xf32, #tpu.memory_space<vmem>>, vector<8x128xf32>
      tpu.vector_store %arg7[%c0_12, %c0_13], %14 {strides = array<i32>} : memref<8x128xf32, #tpu.memory_space<vmem>>, vector<8x128xf32>,
    } else {
    }
    %c0 = arith.constant 0 : index
    %c0_1 = arith.constant 0 : index
    %3 = vector.load %arg7[%c0, %c0_1] : memref<8x128xf32, #tpu.memory_space<vmem>>, vector<8x128xf32>
    %c0_2 = arith.constant 0 : index
    %c0_3 = arith.constant 0 : index
    %4 = vector.load %arg3[%c0_2, %c0_3] : memref<8x128xf32, #tpu.memory_space<vmem>>, vector<8x128xf32>
    %c0_4 = arith.constant 0 : index
    %c0_5 = arith.constant 0 : index
    %5 = vector.load %arg4[%c0_4, %c0_5] : memref<128x128xf32, #tpu.memory_space<vmem>>, vector<128x128xf32>
    %cst = arith.constant dense<0.000000e+00> : vector<8x128xf32>
    %6 = tpu.matmul %4, %5, %cst {dimension_numbers = #tpu.dot_dimension_numbers<[1], [0], [0], [1], [0, 0, 1, 1], [], []>} : vector<8x128xf32>, vector<128x128xf32>, vector<8x128xf32> -> vector<8x128xf32>
    %7 = arith.addf %3, %6 : vector<8x128xf32>
    %c0_6 = arith.constant 0 : index
    %c0_7 = arith.constant 0 : index
    %8 = vector.load %arg7[%c0_6, %c0_7] : memref<8x128xf32, #tpu.memory_space<vmem>>, vector<8x128xf32>
    tpu.vector_store %arg7[%c0_6, %c0_7], %7 {strides = array<i32>} : memref<8x128xf32, #tpu.memory_space<vmem>>, vector<8x128xf32>,
    %c0_i32_8 = arith.constant 0 : i32
    %9 = arith.cmpi eq, %arg2, %c0_i32_8 : i32
    %10 = arith.extui %9 : i1 to i32
    %c0_i32_9 = arith.constant 0 : i32
    %11 = arith.cmpi ne, %10, %c0_i32_9 : i32
    scf.if %11 {
      %c0_10 = arith.constant 0 : index
      %c0_11 = arith.constant 0 : index
      %12 = vector.load %arg7[%c0_10, %c0_11] : memref<8x128xf32, #tpu.memory_space<vmem>>, vector<8x128xf32>
      %cst_12 = arith.constant 0.000000e+00 : f32
      %13 = vector.broadcast %cst_12 : f32 to vector<8x128xf32>
      %14 = arith.maximumf %12, %13 : vector<8x128xf32>
      %c0_13 = arith.constant 0 : index
      %c0_14 = arith.constant 0 : index
      %15 = vector.load %arg6[%c0_13, %c0_14] : memref<8x128xf32, #tpu.memory_space<vmem>>, vector<8x128xf32>
      tpu.vector_store %arg6[%c0_13, %c0_14], %14 {strides = array<i32>} : memref<8x128xf32, #tpu.memory_space<vmem>>, vector<8x128xf32>,
    } else {
    }
    return
  }
  func.func @transform_0(%arg0: i32, %arg1: i32, %arg2: i32) -> (i32, i32) {
    %c0_i32 = arith.constant 0 : i32
    return %arg0, %arg2 : i32, i32
  }
  func.func @transform_1(%arg0: i32, %arg1: i32, %arg2: i32) -> (i32, i32) {
    %c0_i32 = arith.constant 0 : i32
    return %arg2, %arg1 : i32, i32
  }
  func.func @transform_2(%arg0: i32, %arg1: i32, %arg2: i32) -> (i32, i32) {
    %c0_i32 = arith.constant 0 : i32
    %c0_i32_0 = arith.constant 0 : i32
    return %c0_i32, %arg1 : i32, i32
  }
  func.func @transform_3(%arg0: i32, %arg1: i32, %arg2: i32) -> (i32, i32) {
    %c0_i32 = arith.constant 0 : i32
    return %arg0, %arg1 : i32, i32
  }
}

</mosaic_0001>

<bundles_post_ra>
// kernel: tpu_custom_call.1
= control target key start
LH: loop header
LB: loop body
LE: loop exit
PB: predicated region body
PF: predicated region fallthrough
CT: control target
= control target key end

     0   :  { %8 = vsyncpa [#allocation4], 0  ;;  %s852_s0 = inlined_call_operand.hbm [shape: f32[16,128], index: 0, kind: input, shape index: {}]   ;;  %s853_s1 = inlined_call_operand.hbm [shape: f32[128,128], index: 1, kind: input, shape index: {}]   ;;  %s854_s2 = inlined_call_operand.vmem [shape: f32[1,128], index: 2, kind: input, shape index: {}]   ;;  %s855_s3 = inlined_call_operand.hbm [shape: f32[16,128], index: 3, kind: output, shape index: {}]  }
   0x1   :  { %10 = vsyncpa [#allocation4 + $0x1], 0 }
   0x2   :  { %11 = vsyncpa [#allocation7], 0 }
   0x3   :  { %12 = vsyncpa [#allocation5], 0 }
   0x4   :  { %14 = vsyncpa [#allocation5 + $0x1], 0  ;;  %s699_s12 = smov 0   ;;  %s701_s13 = smov 0  }
   0x5   :  { %s703_s14 = smov 0   ;;  %s705_s15 = smov 0  }
   0x6   :  { %s707_s16 = smov 0   ;;  %s709_s17 = smov 0  }
   0x7 LB: > { %s436_s18 = sadd.s32 4294967295, %s674_s17   ;;  %p438_p0 = scmp.ge.s32.totalorder %s674_s17, 1  ;;  %s674_s17 = sphi %s709_s17, %s20_s17   ;;  %s670_s16 = sphi %s707_s16, %s866_s16   ;;  %s666_s15 = sphi %s705_s15, %s865_s15   ;;  %s662_s14 = sphi %s703_s14, %s864_s14   ;;  %s658_s13 = sphi %s701_s13, %s863_s13   ;;  %s654_s12 = sphi %s699_s12, %s862_s12  }
   0x8   : > { %p731_p1 = scmp.eq.s32.totalorder %s436_s18, 0  ;;  %p154_p2 = scmp.lt.s32.totalorder %s674_s17, 3 }
   0x9   : > { %s169_s22 = sshll.u32 %s853_s1, 4  ;;  %s676_s24 = smov [#allocation6]   ;;  %s170_s22 = int_to_ptr.hbm [resolvable:$true] %s169_s22 }
   0xa   : > { %p739_p3 = pnand %p438_p0, %p154_p2  ;;  %s171_s25 = sshll.u32 %s676_s24, 4  ;;  %s172_s25 = int_to_ptr.vmem [resolvable:$true] %s171_s25 }
   0xb   : > { %p441_p6 = scmp.ge.s32.totalorder %s674_s17, 2  ;;  %s677_s26 = smov 128  }
   0xc   : > { %p460_p4 = pneg %p739_p3  ;;  %s678_s27 = smov 8  }
   0xd   : > { %s437_s28 = sadd.s32 4294967294, %s674_s17   ;;  %s39_s29 = sadd.s32 1, %s670_s16 }
   0xe   : > { %p461_p5 = pnand %p460_p4, %p731_p1  ;;  %s48_s30 = sadd.s32 1, %s662_s14 }
   0xf   : > { %p41_p7 = scmp.ge.s32.totalorder %s39_s29, 2  ;;  %p55_p8 = scmp.ne.s32.totalorder %s662_s14, %s658_s13 }
  0x10   : > { %463 = dma.hbm_to_vmem [thread:$0]  (!%p461_p5), %s170_s22, 2048, %s172_s25, [#allocation7], %s677_s26, %s677_s26, %s678_s27  }
  0x11   : > { %p56_p9 = scmp.eq.s32.totalorder %s674_s17, 0  ;;  %p61_p10 = scmp.ne.s32.totalorder %s658_s13, %s654_s12 }
  0x12   : > { %s868_s29 = smov (%p41_p7, %s39_s29), 0  ;;  %p141_p13 = scmp.eq.s32.totalorder %s436_s18, 1 }
  0x13   : > { %p758_p11 = por %p56_p9, %p55_p8  ;;  %p764_p12 = por %p731_p1, %p61_p10 }
  0x14   : > { %s43_s6 = ssub.s32 %s670_s16, %s868_s29  ;;  %p147_p2 = scmp.eq.s32.totalorder %s437_s28, 1 }
  0x15   : > { %p46_p0 = scmp.eq.s32.totalorder %s43_s6, 0  ;;  %p770_p4 = por %p141_p13, %p55_p8 }
  0x16   : > { %p473_p5 = scmp.lt.s32.totalorder %s674_s17, 2  ;;  %p778_p7 = por %p147_p2, %p61_p10 }
  0x17   : > { %s776_s8 = scalar_select %p46_p0, %s662_s14, %s48_s30  }
  0x18   : > { %s191_s10 = sand.u32 1, %s662_s14   ;;  %s443_s20 = sshll.u32 %s670_s16, 3 }
  0x19   : > { %s442_s11 = sshll.u32 %s191_s10, 3  ;;  %s200_s18 = scalar_lea.hbm %s852_s0, %s443_s20 }
  0x1a   : > { %s195_s24 = scalar_lea.vmem [#allocation3], %s442_s11  ;;  %s202_s26 = sshll.u32 %s200_s18, 4  ;;  %s203_s26 = int_to_ptr.hbm [resolvable:$true] %s202_s26 }
  0x1b   : > { %s204_s25 = sshll.u32 %s195_s24, 4  ;;  %p465_p8 = pnand %p473_p5, %p758_p11  ;;  %s205_s25 = int_to_ptr.vmem [resolvable:$true] %s204_s25 }
  0x1c   : > { %s192_s27 = scalar_lea.sflag [#allocation4], %s191_s10  ;;  %213 = sbr.rel (%p739_p3) target bundleno = 201 (0xc9), region = 32 }
  0x1d   : > { %467 = dma.hbm_to_vmem [thread:$0]  (!%p465_p8), %s203_s26, 128, %s205_s25, %s192_s27  }
  0x1e   : > { %s792_s28 = sand.u32 (!%p739_p3), 1, %s658_s13  }
  0x1f   : > { %s445_s30 = sshll.u32 (!%p739_p3), %s792_s28, 3  ;;  %s216_s6 = scalar_lea.sflag (!%p739_p3), [#allocation4], %s792_s28 }
  0x20   : > { %s798_s11 = scalar_lea.vmem (!%p739_p3), [#allocation3], %s445_s30 }
  0x21   : > { %641 = dma.done.wait (%p764_p12), %s216_s6, 128  }
  0x22   : > { %643 = vsyncadd (%p764_p12), %s216_s6, 4294967168 }
  0x23   : > { %645 = dma.done.wait (%p731_p1), [#allocation7], 2048  }
  0x24   : > { %647 = vsyncadd (%p731_p1), [#allocation7], 4294965248  ;;  %v281_v0 = vld [vmem:[#allocation6 + $0x78] sm:$0xff]  ;;  %v280_v1 = vld [vmem:[#allocation6 + $0x70] sm:$0xff]  ;;  %s449_s19 = sshll.u32 %s666_s15, 3  ;;  %s250_s21 = scalar_lea.vmem [#allocation8], %s445_s30 }
  0x25   : > { %282 = vmatpush.msra.mxu0 %v281_v0  ;;  %v279_v2 = vld [vmem:[#allocation6 + $0x68] sm:$0xff]  ;;  %v278_v3 = vld [vmem:[#allocation6 + $0x60] sm:$0xff]  ;;  %v277_v4 = vld [vmem:[#allocation6 + $0x58] sm:$0xff]  ;;  %s322_s20 = scalar_lea.hbm %s855_s3, %s449_s19  ;;  %s324_s22 = sshll.u32 %s250_s21, 4  ;;  %s325_s22 = int_to_ptr.vmem [resolvable:$true] %s324_s22 }
  0x26   : > { %v276_v5 = vld [vmem:[#allocation6 + $0x50] sm:$0xff]  ;;  %v275_v6 = vld [vmem:[#allocation6 + $0x48] sm:$0xff]  ;;  %v274_v7 = vld [vmem:[#allocation6 + $0x40] sm:$0xff]  ;;  %s326_s18 = sshll.u32 %s322_s20, 4  ;;  %s311_s15 = scalar_lea.sflag [#allocation5], %s792_s28  ;;  %s327_s18 = int_to_ptr.hbm [resolvable:$true] %s326_s18 }
  0x27   : > { %283 = vmatpush.msra.mxu0 %v280_v1  ;;  %v273_v8 = vld [vmem:[#allocation6 + $0x38] sm:$0xff]  ;;  %v272_v9 = vld [vmem:[#allocation6 + $0x30] sm:$0xff]  ;;  %v271_v10 = vld [vmem:[#allocation6 + $0x28] sm:$0xff]  ;;  %s602_s24 = sshra.s32 %s327_s18, 4  ;;  %s608_s6 = scalar_lea.hbm %s855_s3, 16  ;;  %s603_s24 = int_to_ptr.hbm [resolvable:$true] %s602_s24 }
  0x28   : > { %v270_v11 = vld [vmem:[#allocation6 + $0x20] sm:$0xff]  ;;  %v269_v12 = vld [vmem:[#allocation6 + $0x18] sm:$0xff]  ;;  %v268_v13 = vld [vmem:[#allocation6 + $0x10] sm:$0xff]  ;;  %s604_s25 = scalar_lea.hbm %s603_s24, 8  ;;  %p609_p10 = scmp.lt.s32.totalorder %s603_s24, %s855_s3 }
  0x29   : > { %284 = vmatpush.msra.mxu0 %v279_v2  ;;  %v267_v14 = vld [vmem:[#allocation6 + $0x8] sm:$0xff]  ;;  %v266_v15 = vld [vmem:[#allocation6] sm:$0xff]  ;;  %v265_v16 = vld [vmem:[%s798_s11] sm:$0xff]  ;;  %p605_p1 = scmp.ne.s32.totalorder %s603_s24, %s604_s25  ;;  %p610_p11 = scmp.lt.s32.totalorder %s608_s6, %s604_s25 }
  0x2a   : > { %v527_v17 = vld [vmem:[%s854_s2] ss:$0 sm:$0xff] }
  0x2b   : > { %285 = vmatpush.msra.mxu0 %v278_v3  ;;  %p606_p3 = pnand %p605_p1, %p770_p4  ;;  %p611_p12 = por %p610_p11, %p609_p10 }
  0x2d   : > { %286 = vmatpush.msra.mxu0 %v277_v4  ;;  %p607_p9 = pneg %p606_p3 }
  0x2f   : > { %287 = vmatpush.msra.mxu0 %v276_v5  ;;  %p612_p13 = pnand %p611_p12, %p607_p9 }
  0x31   : > { %288 = vmatpush.msra.mxu0 %v275_v6 }
  0x33   : > { %289 = vmatpush.msra.mxu0 %v274_v7 }
  0x35   : > { %290 = vmatpush.msra.mxu0 %v273_v8 }
  0x37   : > { %291 = vmatpush.msra.mxu0 %v272_v9 }
  0x39   : > { %292 = vmatpush.msra.mxu0 %v271_v10 }
  0x3b   : > { %293 = vmatpush.msra.mxu0 %v270_v11 }
  0x3d   : > { %294 = vmatpush.msra.mxu0 %v269_v12 }
  0x3f   : > { %295 = vmatpush.msra.mxu0 %v268_v13 }
  0x41   : > { %296 = vmatpush.msra.mxu0 %v267_v14 }
  0x43   : > { %297 = vmatpush.msra.mxu0 %v266_v15 }
  0x44   : > { %298 = vmatmul.f32.vlgmr.msra.gmra.mxu0 %v265_v16 }
  0xc1   : > { %v299_v18 = vpop.f32.mrf.mxu0 }
  0xc2   : > { %v302_v19 = vadd.f32 %v527_v17, %v299_v18 }
  0xc4   : > { %v308_v20 = vmax.f32 %v302_v19, 0.0 }
  0xc6   : > { %309 = vst [vmem:[%s250_s21] sm:$0xff] %v308_v20 }
  0xc7   : > { %615 = shalt.err (!%p612_p13)
}
  0xc8   : > { %458 = dma.vmem_to_hbm [thread:$0]  (%p770_p4), %s325_s22, 128, %s327_s18, %s311_s15  }
  0xc9 PF: > { %s338_s28 = sand.u32 1, %s654_s12   ;;  %p469_p0 = pnand %p441_p6, %p778_p7 }
  0xca   : > { %s339_s19 = scalar_lea.sflag [#allocation5], %s338_s28 }
  0xcb   : > { %p470_p2 = pneg %p469_p0 }
  0xcd   : > { %649 = dma.done.wait (%p470_p2), %s339_s19, 128  }
  0xce   : > { %651 = vsyncadd (%p470_p2), %s339_s19, 4294967168  ;;  %s20_s17 = sadd.s32 1, %s674_s17   ;;  %s862_s12 = smov %s658_s13 }
  0xcf   : > { %p17_p5 = scmp.ge.s32.totalorder %s20_s17, 4   ;;  %s863_s13 = smov %s662_s14 }
  0xd0   : > { %s864_s14 = smov %s776_s8  ;;  %s865_s15 = smov %s670_s16 }
  0xd1   : > { %s866_s16 = smov %s868_s29  ;;  %19 = sbr.rel (!%p17_p5) target bundleno = 7 (0x7), region = 93 }
  0xd6   :  { %345 = vsyncpa [#allocation4], 1 }
  0xd7   :  { %347 = vsyncpa [#allocation4 + $0x1], 1 }
  0xd8   :  { %348 = vsyncpa [#allocation7], 1 }
  0xd9   :  { %349 = vsyncpa [#allocation5], 1 }
  0xda   :  { %351 = vsyncpa [#allocation5 + $0x1], 1 }

</bundles_post_ra>
